<compile_context>
chip_gen: v7x
topology: tpu7x:2x2x1
jax: 0.10.0
libtpu: 0.0.40
codegen_flags: <defaults>
</compile_context>

<pallas_src>
import functools
import numpy as np
import jax
import jax.numpy as jnp
from jax.experimental import pallas as pl
from jax.experimental.pallas import tpu as pltpu

_VMEM_LIMIT = 32 * 1024 * 1024
_NEG = -1e30


def _round_up(x, m):
    return (x + m - 1) // m * m


def _pick_tile(padded, max_tile, unit):
    """Largest multiple of `unit` <= max_tile that divides `padded`."""
    t = min(max_tile, padded)
    t = max(unit, (t // unit) * unit)
    while padded % t != 0:
        t -= unit
    return t


# ---------------------------------------------------------------------------
# Pallas kernels
# ---------------------------------------------------------------------------
def _make_mm_kernel(relu, with_residual, single_k):
    """Tiled matmul kernel with bias(+BN)/residual/ReLU fused in the epilogue.

    single_k=True  -> no reduction loop: dot + epilogue written directly
                      (no f32 VMEM accumulator scratch).
    single_k=False -> standard K-loop accumulation in an f32 VMEM scratch.
    """

    def kernel(*refs):
        if with_residual:
            a_ref, b_ref, bias_ref, r_ref, o_ref = refs[:5]
        else:
            a_ref, b_ref, bias_ref, o_ref = refs[:4]
            r_ref = None

        if single_k:
            out = jnp.dot(a_ref[...], b_ref[...],
                          preferred_element_type=jnp.float32) + bias_ref[...]
            if with_residual:
                out = out + r_ref[...].astype(jnp.float32)
            if relu:
                out = jnp.maximum(out, 0.0)
            o_ref[...] = out.astype(o_ref.dtype)
        else:
            acc_ref = refs[-1]
            k = pl.program_id(2)

            @pl.when(k == 0)
            def _():
                acc_ref[...] = jnp.zeros_like(acc_ref)

            acc_ref[...] += jnp.dot(a_ref[...], b_ref[...],
                                    preferred_element_type=jnp.float32)

            @pl.when(k == pl.num_programs(2) - 1)
            def _():
                out = acc_ref[...] + bias_ref[...]
                if with_residual:
                    out = out + r_ref[...].astype(jnp.float32)
                if relu:
                    out = jnp.maximum(out, 0.0)
                o_ref[...] = out.astype(o_ref.dtype)

    return kernel


def _lerp_kernel(a_ref, b_ref, f_ref, o_ref):
    f = f_ref[...]
    o_ref[...] = a_ref[...] * (1.0 - f) + b_ref[...] * f


def _log_softmax_kernel(x_ref, o_ref):
    x = x_ref[...]                                   # (Cp, tl): reduce sublanes
    m = jnp.max(x, axis=0, keepdims=True)
    lse = jnp.log(jnp.sum(jnp.exp(x - m), axis=0, keepdims=True)) + m
    o_ref[...] = x - lse


# ---------------------------------------------------------------------------
# Pallas wrappers
# ---------------------------------------------------------------------------
@functools.partial(jax.jit, static_argnames=("relu", "out_dtype"))
def matmul_bias(a, wmat, bias, residual=None, *, relu=False,
                out_dtype=jnp.bfloat16):
    """out = a @ wmat + bias [+ residual] [ReLU], tiled bf16 MXU matmul.

    a:        (M, K)   activations (cast to bf16 here)
    wmat:     (Kp, Np) pre-padded bf16 weight matrix (128-aligned, Kp >= K)
    bias:     (1, Np)  f32
    residual: (M, C) or None -- added in the f32 epilogue before ReLU
    Returns the padded (Mp, Np) result; caller slices the valid region.
    """
    M, K = a.shape
    Kp, Np = wmat.shape

    tm = min(512, _round_up(M, 16))
    Mp = _round_up(M, tm)
    tn = _pick_tile(Np, 512, 128)
    tk = _pick_tile(Kp, 2048, 128)
    nk = Kp // tk

    a_p = jnp.pad(a, ((0, Mp - M), (0, Kp - K))).astype(jnp.bfloat16)

    grid = (Mp // tm, Np // tn, nk)
    in_specs = [
        pl.BlockSpec((tm, tk), lambda i, j, k: (i, k)),
        pl.BlockSpec((tk, tn), lambda i, j, k: (k, j)),
        pl.BlockSpec((1, tn), lambda i, j, k: (0, j)),
    ]
    operands = [a_p, wmat, bias]
    with_residual = residual is not None
    if with_residual:
        r_p = jnp.pad(residual, ((0, Mp - residual.shape[0]),
                                 (0, Np - residual.shape[1]))).astype(jnp.bfloat16)
        in_specs.append(pl.BlockSpec((tm, tn), lambda i, j, k: (i, j)))
        operands.append(r_p)

    single_k = (nk == 1)
    kernel = _make_mm_kernel(relu, with_residual, single_k)
    scratch = [] if single_k else [pltpu.VMEM((tm, tn), jnp.float32)]

    return pl.pallas_call(
        kernel,
        out_shape=jax.ShapeDtypeStruct((Mp, Np), out_dtype),
        grid_spec=pltpu.PrefetchScalarGridSpec(
            num_scalar_prefetch=0,
            grid=grid,
            in_specs=in_specs,
            out_specs=pl.BlockSpec((tm, tn), lambda i, j, k: (i, j)),
            scratch_shapes=scratch,
        ),
        compiler_params=pltpu.CompilerParams(
            dimension_semantics=("parallel", "parallel", "arbitrary"),
            vmem_limit_bytes=_VMEM_LIMIT),
    )(*operands)


@functools.partial(jax.jit, static_argnames=("axis",))
def lerp_pallas(a, b, frac, axis):
    """o = a*(1-f) + b*f; f broadcast per-row (axis=0) or per-column (axis=1)."""
    R, L = a.shape
    tr = min(256, _round_up(R, 8))
    Rp = _round_up(R, tr)
    tl = min(2048, _round_up(L, 128))
    Lp = _round_up(L, tl)
    a_p = jnp.pad(a.astype(jnp.float32), ((0, Rp - R), (0, Lp - L)))
    b_p = jnp.pad(b.astype(jnp.float32), ((0, Rp - R), (0, Lp - L)))
    if axis == 0:
        f_p = jnp.pad(frac.astype(jnp.float32), (0, Rp - R)).reshape(Rp, 1)
        f_spec = pl.BlockSpec((tr, 1), lambda i, j: (i, 0))
    else:
        f_p = jnp.pad(frac.astype(jnp.float32), (0, Lp - L)).reshape(1, Lp)
        f_spec = pl.BlockSpec((1, tl), lambda i, j: (0, j))
    out = pl.pallas_call(
        _lerp_kernel,
        out_shape=jax.ShapeDtypeStruct((Rp, Lp), jnp.float32),
        grid_spec=pltpu.PrefetchScalarGridSpec(
            num_scalar_prefetch=0,
            grid=(Rp // tr, Lp // tl),
            in_specs=[pl.BlockSpec((tr, tl), lambda i, j: (i, j)),
                      pl.BlockSpec((tr, tl), lambda i, j: (i, j)),
                      f_spec],
            out_specs=pl.BlockSpec((tr, tl), lambda i, j: (i, j)),
        ),
        compiler_params=pltpu.CompilerParams(
            dimension_semantics=("parallel", "parallel"),
            vmem_limit_bytes=_VMEM_LIMIT),
    )(a_p, b_p, f_p)
    return out[:R, :L]


@jax.jit
def log_softmax_channels_nhwc(x):
    """log_softmax over the channel axis of an NHWC tensor; returns NCHW f32."""
    n, h, w, c = x.shape
    L = n * h * w
    x2 = jnp.transpose(x, (3, 0, 1, 2)).reshape(c, L).astype(jnp.float32)
    Cp = _round_up(c, 8)
    tl = min(2048, _round_up(L, 128))
    Lp = _round_up(L, tl)
    xp = jnp.pad(x2, ((0, Cp - c), (0, Lp - L)), constant_values=_NEG)
    out = pl.pallas_call(
        _log_softmax_kernel,
        out_shape=jax.ShapeDtypeStruct((Cp, Lp), jnp.float32),
        grid_spec=pltpu.PrefetchScalarGridSpec(
            num_scalar_prefetch=0,
            grid=(Lp // tl,),
            in_specs=[pl.BlockSpec((Cp, tl), lambda j: (0, j))],
            out_specs=pl.BlockSpec((Cp, tl), lambda j: (0, j)),
        ),
        compiler_params=pltpu.CompilerParams(
            dimension_semantics=("parallel",),
            vmem_limit_bytes=_VMEM_LIMIT),
    )(xp)
    return out[:c, :L].reshape(c, n, h, w).transpose(1, 0, 2, 3)


# ---------------------------------------------------------------------------
# Plain-JAX glue (im2col, maxpool slices, bilinear gather)
# ---------------------------------------------------------------------------
def conv2d(x, cp, stride=1, pad=0, relu=False, residual=None,
           out_dtype=jnp.bfloat16):
    """NHWC conv = im2col (glue) + Pallas matmul with fused bias/residual/ReLU."""
    n, h, w, cin = x.shape
    kh, kw, cout = cp['kh'], cp['kw'], cp['cout']
    ho = (h + 2 * pad - kh) // stride + 1
    wo = (w + 2 * pad - kw) // stride + 1
    if kh == 1 and kw == 1 and pad == 0:
        xs = x if stride == 1 else x[:, ::stride, ::stride, :]
        a = xs.reshape(n * ho * wo, cin)
    else:
        # TODO(synk): im2col patches are still materialized in HBM; a fully
        # fused in-kernel im2col (kh*kw folded into the K grid axis) would
        # remove this traffic.
        xp = jnp.pad(x, ((0, 0), (pad, pad), (pad, pad), (0, 0)))
        slices = []
        for dy in range(kh):
            for dx in range(kw):
                slices.append(jax.lax.slice(
                    xp, (0, dy, dx, 0),
                    (n, dy + (ho - 1) * stride + 1,
                     dx + (wo - 1) * stride + 1, cin),
                    (1, stride, stride, 1)))
        a = jnp.concatenate(slices, axis=-1).reshape(n * ho * wo, kh * kw * cin)
    res2d = None
    if residual is not None:
        res2d = residual.reshape(n * ho * wo, residual.shape[-1])
    out = matmul_bias(a, cp['wmat'], cp['bias'], res2d,
                      relu=relu, out_dtype=out_dtype)
    return out[:n * ho * wo, :cout].reshape(n, ho, wo, cout)


def maxpool_3x3_s2_p1(x):
    # TODO(synk): max-pool kept as plain-JAX strided-slice running max (glue);
    # under the top-level jit XLA fuses the 9-way max into a single pass.
    n, h, w, c = x.shape
    xp = jnp.pad(x, ((0, 0), (1, 1), (1, 1), (0, 0)),
                 constant_values=-jnp.inf)
    ho = (h + 2 - 3) // 2 + 1
    wo = (w + 2 - 3) // 2 + 1
    out = None
    for dy in range(3):
        for dx in range(3):
            s = jax.lax.slice(xp, (0, dy, dx, 0),
                              (n, dy + (ho - 1) * 2 + 1,
                               dx + (wo - 1) * 2 + 1, c),
                              (1, 2, 2, 1))
            out = s if out is None else jnp.maximum(out, s)
    return out


def _interp_taps(in_size, out_size):
    """1-D bilinear taps for align_corners=True (UpsamplingBilinear2d)."""
    if in_size == 1 or out_size == 1:
        lo = np.zeros((out_size,), np.int32)
        return lo, lo.copy(), np.zeros((out_size,), np.float32)
    src = np.arange(out_size, dtype=np.float64) * (in_size - 1) / (out_size - 1)
    lo = np.clip(np.floor(src), 0, in_size - 1).astype(np.int32)
    hi = np.minimum(lo + 1, in_size - 1).astype(np.int32)
    frac = (src - lo).astype(np.float32)
    return lo, hi, frac


def upsample_bilinear(x, scale):
    """NHWC bilinear upsample (align_corners=True): 2-tap gather + Pallas lerp."""
    n, h, w, c = x.shape
    ho, wo = h * scale, w * scale
    x = x.astype(jnp.float32)
    # interpolate along H
    lo, hi, frac = _interp_taps(h, ho)
    a = jnp.take(x, jnp.asarray(lo), axis=1).reshape(n * ho, w * c)
    b = jnp.take(x, jnp.asarray(hi), axis=1).reshape(n * ho, w * c)
    y = lerp_pallas(a, b, jnp.asarray(np.tile(frac, n)), axis=0)
    y = y.reshape(n, ho, w, c)
    # interpolate along W
    lo, hi, frac = _interp_taps(w, wo)
    a = jnp.take(y, jnp.asarray(lo), axis=2).reshape(n * ho, wo * c)
    b = jnp.take(y, jnp.asarray(hi), axis=2).reshape(n * ho, wo * c)
    y = lerp_pallas(a, b, jnp.asarray(np.repeat(frac, c)), axis=1)
    return y.reshape(n, ho, wo, c)


# ---------------------------------------------------------------------------
# Deterministic synthetic parameters (ResNet-50 + FCN heads), pre-packed
# ---------------------------------------------------------------------------
class KeyGen:
    def __init__(self, seed):
        self._key = jax.random.PRNGKey(seed)

    def next(self):
        self._key, sub = jax.random.split(self._key)
        return sub


def conv_weights(kg, cout, cin, kh, kw, std):
    w = std * jax.random.normal(kg.next(), (cout, cin, kh, kw), jnp.float32)
    return w, jnp.zeros((cout,), jnp.float32)


def bn_params(c):
    # frozen BN: gamma=1, beta=0, running_mean=0, running_var=1
    return (jnp.ones((c,), jnp.float32), jnp.zeros((c,), jnp.float32),
            jnp.zeros((c,), jnp.float32), jnp.ones((c,), jnp.float32))


def fold_bn(w, b, bn, eps=1e-5):
    gamma, beta, mean, var = bn
    scale = gamma / jnp.sqrt(var + eps)
    return w * scale[:, None, None, None], (b - mean) * scale + beta


def pack_conv(w, b, bn=None):
    """Fold frozen BN, reshape to a (K, Cout) im2col matrix, pad to 128
    multiples and cast to bf16 -- done once at parameter-build time."""
    if bn is not None:
        w, b = fold_bn(w, b, bn)
    cout, cin, kh, kw = w.shape
    K = cin * kh * kw
    wmat = jnp.transpose(w, (2, 3, 1, 0)).reshape(K, cout)   # (kh,kw,cin,cout)
    Kp, Np = _round_up(K, 128), _round_up(cout, 128)
    wmat = jnp.pad(wmat, ((0, Kp - K), (0, Np - cout))).astype(jnp.bfloat16)
    bias = jnp.pad(b, (0, Np - cout)).astype(jnp.float32).reshape(1, Np)
    return {'wmat': wmat, 'bias': bias, 'kh': kh, 'kw': kw,
            'cin': cin, 'cout': cout}


def make_bottleneck(kg, inplanes, planes, stride):
    p = {'stride': stride}
    w, b = conv_weights(kg, planes, inplanes, 1, 1, np.sqrt(2.0 / inplanes))
    p['conv1'] = pack_conv(w, b, bn_params(planes))
    w, b = conv_weights(kg, planes, planes, 3, 3, np.sqrt(2.0 / (planes * 9)))
    p['conv2'] = pack_conv(w, b, bn_params(planes))
    w, b = conv_weights(kg, planes * 4, planes, 1, 1, np.sqrt(2.0 / planes))
    p['conv3'] = pack_conv(w, b, bn_params(planes * 4))
    if stride != 1 or inplanes != planes * 4:
        w, b = conv_weights(kg, planes * 4, inplanes, 1, 1,
                            np.sqrt(2.0 / inplanes))
        p['down'] = pack_conv(w, b, bn_params(planes * 4))
    return p


def make_layer(kg, inplanes, planes, blocks, stride):
    layer = [make_bottleneck(kg, inplanes, planes, stride)]
    inplanes = planes * 4
    for _ in range(blocks - 1):
        layer.append(make_bottleneck(kg, inplanes, planes, 1))
    return layer, inplanes


def make_pred_block(kg, cin, cmid, cout, k2, mult):
    std1 = np.sqrt(2.0 / (mult * 3 * 3 * cin))
    std2 = np.sqrt(2.0 / (mult * k2 * k2 * cmid))
    w1, b1 = conv_weights(kg, cmid, cin, 3, 3, std1)
    w2, b2 = conv_weights(kg, cout, cmid, k2, k2, std2)
    return {'conv1': pack_conv(w1, b1), 'conv2': pack_conv(w2, b2),
            'k2_pad': k2 // 2}


def build_params(num_out_channels, seed=1):
    kg = KeyGen(seed)
    params = {}
    w, b = conv_weights(kg, 64, 3, 7, 7, np.sqrt(2.0 / (3 * 49)))
    params['conv1'] = pack_conv(w, b, bn_params(64))
    inplanes = 64
    params['layer1'], inplanes = make_layer(kg, inplanes, 64, 3, 1)
    params['layer2'], inplanes = make_layer(kg, inplanes, 128, 4, 2)
    params['layer3'], inplanes = make_layer(kg, inplanes, 256, 6, 2)
    params['layer4'], inplanes = make_layer(kg, inplanes, 512, 3, 2)
    params['pred4'] = make_pred_block(kg, 2048, 512, num_out_channels, 7, 1.0)
    params['pred3'] = make_pred_block(kg, 1024, 256, num_out_channels, 5, 2.0)
    params['pred2'] = make_pred_block(kg, 512, 256, num_out_channels, 5, 1.0)
    params['pred1'] = make_pred_block(kg, 256, 256, num_out_channels, 5, 0.5)
    return params


# ---------------------------------------------------------------------------
# Forward pass
# ---------------------------------------------------------------------------
def bottleneck_forward(p, x):
    out = conv2d(x, p['conv1'], stride=1, pad=0, relu=True)
    out = conv2d(out, p['conv2'], stride=p['stride'], pad=1, relu=True)
    if 'down' in p:
        identity = conv2d(x, p['down'], stride=p['stride'], pad=0, relu=False)
    else:
        identity = x
    # conv3 (+ frozen BN) with the residual add + ReLU fused into the epilogue
    return conv2d(out, p['conv3'], stride=1, pad=0, relu=True,
                  residual=identity)


def pred_block_forward(p, x, upscale):
    y = conv2d(x, p['conv1'], stride=1, pad=1, relu=True)
    y = conv2d(y, p['conv2'], stride=1, pad=p['k2_pad'], relu=False,
               out_dtype=jnp.float32)
    if upscale > 1:
        y = upsample_bilinear(y, upscale)
    return y


def resnet50_fcn_forward(params, x_nchw):
    # NHWC, bf16 activations end-to-end; returns NCHW f32 log-probabilities.
    x = jnp.transpose(x_nchw, (0, 2, 3, 1)).astype(jnp.bfloat16)
    feat0 = conv2d(x, params['conv1'], stride=2, pad=3, relu=True)
    h = maxpool_3x3_s2_p1(feat0)
    for blk in params['layer1']:
        h = bottleneck_forward(blk, h)
    feat1 = h
    for blk in params['layer2']:
        h = bottleneck_forward(blk, h)
    feat2 = h
    for blk in params['layer3']:
        h = bottleneck_forward(blk, h)
    feat3 = h
    for blk in params['layer4']:
        h = bottleneck_forward(blk, h)
    feat4 = h

    out4 = pred_block_forward(params['pred4'], feat4, 8)
    out3 = pred_block_forward(params['pred3'], feat3, 4)
    out2 = pred_block_forward(params['pred2'], feat2, 2)
    out1 = pred_block_forward(params['pred1'], feat1, 1)

    ave_out = out4 + out3 + out2 + out1          # tiny 4-way add (plain glue)
    output = upsample_bilinear(ave_out, 4)
    return log_softmax_channels_nhwc(output)


def make_forward(params):
    """Single jitted end-to-end forward.

    Array leaves are passed as jit arguments (so weights are NOT baked into
    the executable as constants); integer metadata (kernel sizes, strides,
    padding) stays as captured Python ints so it remains static at trace time.
    """
    leaves, treedef = jax.tree_util.tree_flatten(params)
    is_array = [isinstance(l, jax.Array) for l in leaves]
    array_leaves = [l for l, a in zip(leaves, is_array) if a]

    @jax.jit
    def _fwd(arrays, x):
        it = iter(arrays)
        merged = [next(it) if a else l for l, a in zip(leaves, is_array)]
        p = jax.tree_util.tree_unflatten(treedef, merged)
        return resnet50_fcn_forward(p, x)

    return lambda x: _fwd(array_leaves, x)


if __name__ == "__main__":
    num_out_channels = 4
    params = build_params(num_out_channels, seed=1)
    forward = make_forward(params)
    x = jax.random.normal(jax.random.PRNGKey(0), (2, 3, 64, 64), jnp.float32)
    out = forward(x)
    out = jax.block_until_ready(out)
    assert out.shape == (2, num_out_channels, 64, 64), out.shape
    assert bool(jnp.all(jnp.isfinite(out)))
    print("KERNEL_OK")
</pallas_src>

<mosaic_0001>
module attributes {stable_mosaic.version = 11 : i64} {
  func.func @kernel(%arg0: i32, %arg1: i32, %arg2: i32, %arg3: memref<512x256xbf16, #tpu.memory_space<vmem>>, %arg4: memref<256x128xbf16, #tpu.memory_space<vmem>>, %arg5: memref<1x128xf32, #tpu.memory_space<vmem>>, %arg6: memref<512x128xbf16, #tpu.memory_space<vmem>>) attributes {dimension_semantics = [#tpu.dimension_semantics<parallel>, #tpu.dimension_semantics<parallel>, #tpu.dimension_semantics<arbitrary>], iteration_bounds = array<i64: 4, 1, 1>, scalar_prefetch = 0 : i64, scratch_operands = 0 : i64, tpu.core_type = #tpu.core_type<tc>, window_params = [{transform_indices = @transform_0, window_bounds = array<i64: 512, 256>}, {transform_indices = @transform_1, window_bounds = array<i64: 256, 128>}, {transform_indices = @transform_2, window_bounds = array<i64: 1, 128>}, {transform_indices = @transform_3, window_bounds = array<i64: 512, 128>}]} {
    %c0 = arith.constant 0 : index
    %c0_0 = arith.constant 0 : index
    %0 = vector.load %arg3[%c0, %c0_0] : memref<512x256xbf16, #tpu.memory_space<vmem>>, vector<512x256xbf16>
    %c0_1 = arith.constant 0 : index
    %c0_2 = arith.constant 0 : index
    %1 = vector.load %arg4[%c0_1, %c0_2] : memref<256x128xbf16, #tpu.memory_space<vmem>>, vector<256x128xbf16>
    %cst = arith.constant dense<0.000000e+00> : vector<512x128xf32>
    %2 = tpu.matmul %0, %1, %cst {dimension_numbers = #tpu.dot_dimension_numbers<[1], [0], [0], [1], [0, 0, 1, 1], [], []>} : vector<512x256xbf16>, vector<256x128xbf16>, vector<512x128xf32> -> vector<512x128xf32>
    %c0_3 = arith.constant 0 : index
    %c0_4 = arith.constant 0 : index
    %3 = vector.load %arg5[%c0_3, %c0_4] : memref<1x128xf32, #tpu.memory_space<vmem>>, vector<1x128xf32>
    %4 = vector.broadcast %3 : vector<1x128xf32> to vector<512x128xf32>
    %5 = arith.addf %2, %4 : vector<512x128xf32>
    %cst_5 = arith.constant 0.000000e+00 : f32
    %6 = vector.broadcast %cst_5 : f32 to vector<512x128xf32>
    %7 = arith.maximumf %5, %6 : vector<512x128xf32>
    %8 = arith.truncf %7 : vector<512x128xf32> to vector<512x128xbf16>
    %c0_6 = arith.constant 0 : index
    %c0_7 = arith.constant 0 : index
    %9 = vector.load %arg6[%c0_6, %c0_7] : memref<512x128xbf16, #tpu.memory_space<vmem>>, vector<512x128xbf16>
    tpu.vector_store %arg6[%c0_6, %c0_7], %8 {strides = array<i32>} : memref<512x128xbf16, #tpu.memory_space<vmem>>, vector<512x128xbf16>,
    return
  }
  func.func @transform_0(%arg0: i32, %arg1: i32, %arg2: i32) -> (i32, i32) {
    %c0_i32 = arith.constant 0 : i32
    return %arg0, %arg2 : i32, i32
  }
  func.func @transform_1(%arg0: i32, %arg1: i32, %arg2: i32) -> (i32, i32) {
    %c0_i32 = arith.constant 0 : i32
    return %arg2, %arg1 : i32, i32
  }
  func.func @transform_2(%arg0: i32, %arg1: i32, %arg2: i32) -> (i32, i32) {
    %c0_i32 = arith.constant 0 : i32
    %c0_i32_0 = arith.constant 0 : i32
    return %c0_i32, %arg1 : i32, i32
  }
  func.func @transform_3(%arg0: i32, %arg1: i32, %arg2: i32) -> (i32, i32) {
    %c0_i32 = arith.constant 0 : i32
    return %arg0, %arg1 : i32, i32
  }
}

</mosaic_0001>

<bundles_post_ra>
// kernel: matmul_bias.1
= control target key start
LH: loop header
LB: loop body
LE: loop exit
PB: predicated region body
PF: predicated region fallthrough
CT: control target
= control target key end

     0   :  { %8 = vsyncpa [#allocation3], 0  ;;  %s2670_s0 = inlined_call_operand.vmem [shape: bf16[2048,256], index: 0, kind: input, shape index: {}]   ;;  %s2671_s1 = inlined_call_operand.vmem [shape: bf16[256,128], index: 1, kind: input, shape index: {}]   ;;  %s2672_s2 = inlined_call_operand.vmem [shape: f32[1,128], index: 2, kind: input, shape index: {}]   ;;  %s2673_s3 = inlined_call_operand.hbm [shape: bf16[2048,128], index: 3, kind: output, shape index: {}]  }
   0x1   :  { %10 = vsyncpa [#allocation3 + $0x1], 0  ;;  %s2302_s12 = smov 0   ;;  %s2304_s13 = smov 0  }
   0x2   :  { %s2306_s14 = smov 0   ;;  %s2308_s15 = smov 0  }
   0x3   :  { %s2310_s16 = smov 0   ;;  %s2312_s17 = smov 0  }
   0x4 LB: > { %s1578_s18 = sadd.s32 4294967295, %s2276_s17   ;;  %s1579_s19 = sadd.s32 4294967294, %s2276_s17   ;;  %s2276_s17 = sphi %s2312_s17, %s16_s17   ;;  %s2272_s16 = sphi %s2310_s16, %s2680_s16   ;;  %s2268_s15 = sphi %s2308_s15, %s2679_s15   ;;  %s2264_s14 = sphi %s2306_s14, %s2678_s14   ;;  %s2260_s13 = sphi %s2304_s13, %s2677_s13   ;;  %s2256_s12 = sphi %s2302_s12, %s2676_s12  }
   0x5   : > { %s35_s20 = sadd.s32 1, %s2272_s16  ;;  %s126_s21 = sadd.s32 1, %s2264_s14 }
   0x6   : > { %p37_p0 = scmp.ge.s32.totalorder %s35_s20, 4  ;;  %p136_p1 = scmp.ne.s32.totalorder %s2264_s14, %s2260_s13 }
   0x7   : > { %p137_p2 = scmp.eq.s32.totalorder %s1578_s18, 3  ;;  %p142_p3 = scmp.ne.s32.totalorder %s2260_s13, %s2256_s12 }
   0x8   : > { %s2682_s20 = smov (%p37_p0, %s35_s20), 0  ;;  %p143_p5 = scmp.eq.s32.totalorder %s1579_s19, 3 }
   0x9   : > { %p2342_p4 = por %p137_p2, %p136_p1  ;;  %s121_s23 = ssub.s32 %s2272_s16, %s2682_s20 }
   0xa   : > { %p1584_p6 = scmp.ge.s32.totalorder %s2276_s17, 1  ;;  %p124_p7 = scmp.eq.s32.totalorder %s121_s23, 0 }
   0xb   : > { %p2349_p8 = por %p143_p5, %p142_p3  ;;  %p194_p9 = scmp.lt.s32.totalorder %s2276_s17, 5 }
   0xc   : > { %s2355_s25 = scalar_select %p124_p7, %s2264_s14, %s126_s21  }
   0xd   : > { %p195_p10 = pnand %p1584_p6, %p194_p9 }
   0xe   : > { %v2086_v0 = vld [vmem:[%s2671_s1] sm:$0xff] (!%p195_p10)   ;;  %v2278_v1 = vmov (!%p195_p10), 0   ;;  %s1586_s28 = sshll.u32 (!%p195_p10), %s2268_s15, 6  ;;  %v2087_v2 = vld [vmem:[%s2671_s1 + $0x8] sm:$0xff] (!%p195_p10)   ;;  %v2088_v3 = vld [vmem:[%s2671_s1 + $0x10] sm:$0xff] (!%p195_p10)   ;;  %s231_s5 = sand.u32 (!%p195_p10), 1, %s2260_s13  }
   0xf   : > { %198 = sbr.rel (%p195_p10) target bundleno = 434 (0x1b2), region = 32  ;;  %779 = vmatprep.subr.bf16.mxu0 (!%p195_p10), %v2278_v1  ;;  %1996 = vmatprep.subr.bf16.mxu1 (!%p195_p10), %v2278_v1  ;;  %p236_p11 = scmp.lt.s32.totalorder (!%p195_p10), %s1586_s28, 255  ;;  %v2089_v4 = vld [vmem:[%s2671_s1 + $0x18] sm:$0xff] (!%p195_p10)   ;;  %v2090_v5 = vld [vmem:[%s2671_s1 + $0x20] sm:$0xff] (!%p195_p10)   ;;  %v2091_v7 = vld [vmem:[%s2671_s1 + $0x28] sm:$0xff] (!%p195_p10)  }
  0x10   : > { %780 = vmatpush1.bf16.msra.mxu0 (!%p195_p10), %v2086_v0  ;;  %2012 = vmatpush1.bf16.msra.mxu1 (!%p195_p10), %v2086_v0  ;;  %v2092_v9 = vld [vmem:[%s2671_s1 + $0x30] sm:$0xff] (!%p195_p10)   ;;  %v2093_v10 = vld [vmem:[%s2671_s1 + $0x38] sm:$0xff] (!%p195_p10)   ;;  %v2094_v11 = vld [vmem:[%s2671_s1 + $0x40] sm:$0xff] (!%p195_p10)   ;;  %s1804_s7 = sshll.u32 (!%p195_p10), %s2268_s15, 12  ;;  %s2624_s15 = scalar_lea.sflag (!%p195_p10), [#allocation3], %s231_s5 }
  0x11   : > { %781 = vmatprep.subr.bf16.mxu0 (!%p195_p10), %v2278_v1  ;;  %1997 = vmatprep.subr.bf16.mxu1 (!%p195_p10), %v2278_v1  ;;  %v2095_v12 = vld [vmem:[%s2671_s1 + $0x48] sm:$0xff] (!%p195_p10)   ;;  %v2096_v13 = vld [vmem:[%s2671_s1 + $0x50] sm:$0xff] (!%p195_p10)   ;;  %v2097_v14 = vld [vmem:[%s2671_s1 + $0x58] sm:$0xff] (!%p195_p10)   ;;  %s2616_s11 = scalar_lea.hbm (!%p195_p10), %s2673_s3, %s1804_s7  ;;  %s2279_s21 = smov (!%p195_p10), [#allocation2]  }
  0x12   : > { %v2098_v15 = vld [vmem:[%s2671_s1 + $0x60] sm:$0xff] (!%p195_p10)   ;;  %v2099_v16 = vld [vmem:[%s2671_s1 + $0x68] sm:$0xff] (!%p195_p10)   ;;  %v2100_v17 = vld [vmem:[%s2671_s1 + $0x70] sm:$0xff] (!%p195_p10)   ;;  %s2202_s23 = sshll.u32 (!%p195_p10), %s2279_s21, 4  ;;  %s2203_s23 = int_to_ptr.vmem [resolvable:$false] %s2202_s23 }
  0x13   : > { %v2101_v18 = vld [vmem:[%s2671_s1 + $0x78] sm:$0xff] (!%p195_p10)   ;;  %s2204_s26 = scalar_lea.vmem (!%p195_p10), %s2203_s23, 8192 }
  0x14   : > { %782 = vmatpush1.bf16.msra.mxu0 (!%p195_p10), %v2087_v2  ;;  %2013 = vmatpush1.bf16.msra.mxu1 (!%p195_p10), %v2087_v2 }
  0x15   : > { %783 = vmatprep.subr.bf16.mxu0 (!%p195_p10), %v2278_v1  ;;  %1998 = vmatprep.subr.bf16.mxu1 (!%p195_p10), %v2278_v1 }
  0x16   : > { %s2684_s28 = smov (!%p236_p11, %s1586_s28), 255 }
  0x17   : > { %s1739_s8 = sshll.u32 %s2684_s28, 3 }
  0x18   : > { %784 = vmatpush1.bf16.msra.mxu0 %v2088_v3  ;;  %2014 = vmatpush1.bf16.msra.mxu1 %v2088_v3  ;;  %s2384_s19 = scalar_lea.vmem %s2670_s0, %s1739_s8 }
  0x19   : > { %785 = vmatprep.subr.bf16.mxu0 %v2278_v1  ;;  %1999 = vmatprep.subr.bf16.mxu1 %v2278_v1  ;;  %v2104_v6 = vld [vmem:[%s2384_s19 + $0x4] ss:$8 sps:$4 sm:$0xff]   ;;  %v2102_v19 = vld [vmem:[%s2384_s19] ss:$8 sps:$4 sm:$0xff]   ;;  %v2108_v21 = vld [vmem:[%s2384_s19 + $0x14] ss:$8 sps:$4 sm:$0xff]  }
  0x1a   : > { %v2107_v8 = vld [vmem:[%s2384_s19 + $0x104] ss:$8 sps:$4 sm:$0xff]   ;;  %811 = vmatprep.mubr.bf16.mxu0 %v2104_v6  ;;  %v2105_v20 = vld [vmem:[%s2384_s19 + $0x100] ss:$8 sps:$4 sm:$0xff]   ;;  %v2110_v22 = vld [vmem:[%s2384_s19 + $0x114] ss:$8 sps:$4 sm:$0xff]  }
  0x1b   : > { %939 = vmatprep.mubr.bf16.mxu1 %v2107_v8  ;;  %v2112_v23 = vld [vmem:[%s2384_s19 + $0x10] ss:$8 sps:$4 sm:$0xff]   ;;  %v2114_v25 = vld [vmem:[%s2384_s19 + $0x24] ss:$8 sps:$4 sm:$0xff]   ;;  %v2118_v27 = vld [vmem:[%s2384_s19 + $0x20] ss:$8 sps:$4 sm:$0xff]  }
  0x1c   : > { %786 = vmatpush1.bf16.msra.mxu0 %v2089_v4  ;;  %2015 = vmatpush1.bf16.msra.mxu1 %v2089_v4  ;;  %v2113_v24 = vld [vmem:[%s2384_s19 + $0x110] ss:$8 sps:$4 sm:$0xff]   ;;  %v2116_v26 = vld [vmem:[%s2384_s19 + $0x124] ss:$8 sps:$4 sm:$0xff]   ;;  %v2119_v28 = vld [vmem:[%s2384_s19 + $0x120] ss:$8 sps:$4 sm:$0xff]  }
  0x1d   : > { %787 = vmatprep.subr.bf16.mxu0 %v2278_v1  ;;  %2000 = vmatprep.subr.bf16.mxu1 %v2278_v1  ;;  %v2120_v29 = vld [vmem:[%s2384_s19 + $0x34] ss:$8 sps:$4 sm:$0xff]   ;;  %v2124_v31 = vld [vmem:[%s2384_s19 + $0x30] ss:$8 sps:$4 sm:$0xff]   ;;  %v2126_v33 = vld [vmem:[%s2384_s19 + $0x44] ss:$8 sps:$4 sm:$0xff]  }
  0x1e   : > { %v2122_v30 = vld [vmem:[%s2384_s19 + $0x134] ss:$8 sps:$4 sm:$0xff]   ;;  %v2125_v32 = vld [vmem:[%s2384_s19 + $0x130] ss:$8 sps:$4 sm:$0xff]   ;;  %v2128_v34 = vld [vmem:[%s2384_s19 + $0x144] ss:$8 sps:$4 sm:$0xff]  }
  0x1f   : > { %v2130_v35 = vld [vmem:[%s2384_s19 + $0x40] ss:$8 sps:$4 sm:$0xff]   ;;  %v2132_v37 = vld [vmem:[%s2384_s19 + $0x54] ss:$8 sps:$4 sm:$0xff]   ;;  %v2136_v39 = vld [vmem:[%s2384_s19 + $0x50] ss:$8 sps:$4 sm:$0xff]  }
  0x20   : > { %788 = vmatpush1.bf16.msra.mxu0 %v2090_v5  ;;  %2016 = vmatpush1.bf16.msra.mxu1 %v2090_v5  ;;  %v2131_v36 = vld [vmem:[%s2384_s19 + $0x140] ss:$8 sps:$4 sm:$0xff]   ;;  %v2134_v38 = vld [vmem:[%s2384_s19 + $0x154] ss:$8 sps:$4 sm:$0xff]   ;;  %v2137_v40 = vld [vmem:[%s2384_s19 + $0x150] ss:$8 sps:$4 sm:$0xff]  }
  0x21   : > { %789 = vmatprep.subr.bf16.mxu0 %v2278_v1  ;;  %2001 = vmatprep.subr.bf16.mxu1 %v2278_v1  ;;  %v2138_v41 = vld [vmem:[%s2384_s19 + $0x64] ss:$8 sps:$4 sm:$0xff]   ;;  %v2142_v43 = vld [vmem:[%s2384_s19 + $0x60] ss:$8 sps:$4 sm:$0xff]   ;;  %v2144_v45 = vld [vmem:[%s2384_s19 + $0x74] ss:$8 sps:$4 sm:$0xff]  }
  0x22   : > { %v2140_v42 = vld [vmem:[%s2384_s19 + $0x164] ss:$8 sps:$4 sm:$0xff]   ;;  %v2143_v44 = vld [vmem:[%s2384_s19 + $0x160] ss:$8 sps:$4 sm:$0xff]   ;;  %v2146_v46 = vld [vmem:[%s2384_s19 + $0x174] ss:$8 sps:$4 sm:$0xff]  }
  0x23   : > { %v2148_v47 = vld [vmem:[%s2384_s19 + $0x70] ss:$8 sps:$4 sm:$0xff]   ;;  %v2150_v49 = vld [vmem:[%s2384_s19 + $0x84] ss:$8 sps:$4 sm:$0xff]   ;;  %v2154_v51 = vld [vmem:[%s2384_s19 + $0x80] ss:$8 sps:$4 sm:$0xff]  }
  0x24   : > { %790 = vmatpush1.bf16.msra.mxu0 %v2091_v7  ;;  %2017 = vmatpush1.bf16.msra.mxu1 %v2091_v7  ;;  %v2149_v48 = vld [vmem:[%s2384_s19 + $0x170] ss:$8 sps:$4 sm:$0xff]   ;;  %v2152_v50 = vld [vmem:[%s2384_s19 + $0x184] ss:$8 sps:$4 sm:$0xff]   ;;  %v2155_v52 = vld [vmem:[%s2384_s19 + $0x180] ss:$8 sps:$4 sm:$0xff]  }
  0x25   : > { %791 = vmatprep.subr.bf16.mxu0 %v2278_v1  ;;  %2002 = vmatprep.subr.bf16.mxu1 %v2278_v1  ;;  %v2156_v53 = vld [vmem:[%s2384_s19 + $0x94] ss:$8 sps:$4 sm:$0xff]   ;;  %v2160_v55 = vld [vmem:[%s2384_s19 + $0x90] ss:$8 sps:$4 sm:$0xff]   ;;  %v2162_v57 = vld [vmem:[%s2384_s19 + $0xa4] ss:$8 sps:$4 sm:$0xff]  }
  0x26   : > { %v2158_v54 = vld [vmem:[%s2384_s19 + $0x194] ss:$8 sps:$4 sm:$0xff]   ;;  %v2161_v56 = vld [vmem:[%s2384_s19 + $0x190] ss:$8 sps:$4 sm:$0xff]   ;;  %v2164_v58 = vld [vmem:[%s2384_s19 + $0x1a4] ss:$8 sps:$4 sm:$0xff]  }
  0x27   : > { %v2166_v59 = vld [vmem:[%s2384_s19 + $0xa0] ss:$8 sps:$4 sm:$0xff]   ;;  %v2168_v61 = vld [vmem:[%s2384_s19 + $0xb4] ss:$8 sps:$4 sm:$0xff]   ;;  %v2172_v63 = vld [vmem:[%s2384_s19 + $0xb0] ss:$8 sps:$4 sm:$0xff]  }
  0x28   : > { %792 = vmatpush1.bf16.msra.mxu0 %v2092_v9  ;;  %2018 = vmatpush1.bf16.msra.mxu1 %v2092_v9  ;;  %v2167_v60 = vld [vmem:[%s2384_s19 + $0x1a0] ss:$8 sps:$4 sm:$0xff]   ;;  %v2170_v62 = vld [vmem:[%s2384_s19 + $0x1b4] ss:$8 sps:$4 sm:$0xff]   ;;  %v2173_v0 = vld [vmem:[%s2384_s19 + $0x1b0] ss:$8 sps:$4 sm:$0xff]  }
  0x29   : > { %793 = vmatprep.subr.bf16.mxu0 %v2278_v1  ;;  %2003 = vmatprep.subr.bf16.mxu1 %v2278_v1  ;;  %v2176_v2 = vld [vmem:[%s2384_s19 + $0x1c4] ss:$8 sps:$4 sm:$0xff]   ;;  %v2178_v3 = vld [vmem:[%s2384_s19 + $0xc0] ss:$8 sps:$4 sm:$0xff]   ;;  %v2180_v5 = vld [vmem:[%s2384_s19 + $0xd4] ss:$8 sps:$4 sm:$0xff]  }
  0x2a   : > { %v2179_v4 = vld [vmem:[%s2384_s19 + $0x1c0] ss:$8 sps:$4 sm:$0xff]   ;;  %v2182_v6 = vld [vmem:[%s2384_s19 + $0x1d4] ss:$8 sps:$4 sm:$0xff]   ;;  %v2184_v7 = vld [vmem:[%s2384_s19 + $0xd0] ss:$8 sps:$4 sm:$0xff]  }
  0x2b   : > { %v2185_v8 = vld [vmem:[%s2384_s19 + $0x1d0] ss:$8 sps:$4 sm:$0xff]   ;;  %v2186_v9 = vld [vmem:[%s2384_s19 + $0xe4] ss:$8 sps:$4 sm:$0xff]  }
  0x2c   : > { %794 = vmatpush1.bf16.msra.mxu0 %v2093_v10  ;;  %2019 = vmatpush1.bf16.msra.mxu1 %v2093_v10  ;;  %v2188_v10 = vld [vmem:[%s2384_s19 + $0x1e4] ss:$8 sps:$4 sm:$0xff]  }
  0x2d   : > { %795 = vmatprep.subr.bf16.mxu0 %v2278_v1  ;;  %2004 = vmatprep.subr.bf16.mxu1 %v2278_v1 }
  0x30   : > { %796 = vmatpush1.bf16.msra.mxu0 %v2094_v11  ;;  %2020 = vmatpush1.bf16.msra.mxu1 %v2094_v11  ;;  %v2190_v11 = vld [vmem:[%s2384_s19 + $0xe0] ss:$8 sps:$4 sm:$0xff]  }
  0x31   : > { %797 = vmatprep.subr.bf16.mxu0 %v2278_v1  ;;  %2005 = vmatprep.subr.bf16.mxu1 %v2278_v1 }
  0x34   : > { %798 = vmatpush1.bf16.msra.mxu0 %v2095_v12  ;;  %2021 = vmatpush1.bf16.msra.mxu1 %v2095_v12  ;;  %v2191_v12 = vld [vmem:[%s2384_s19 + $0x1e0] ss:$8 sps:$4 sm:$0xff]  }
  0x35   : > { %799 = vmatprep.subr.bf16.mxu0 %v2278_v1  ;;  %2006 = vmatprep.subr.bf16.mxu1 %v2278_v1 }
  0x38   : > { %800 = vmatpush1.bf16.msra.mxu0 %v2096_v13  ;;  %2022 = vmatpush1.bf16.msra.mxu1 %v2096_v13  ;;  %v2192_v13 = vld [vmem:[%s2384_s19 + $0xf4] ss:$8 sps:$4 sm:$0xff]  }
  0x39   : > { %801 = vmatprep.subr.bf16.mxu0 %v2278_v1  ;;  %2007 = vmatprep.subr.bf16.mxu1 %v2278_v1 }
  0x3c   : > { %802 = vmatpush1.bf16.msra.mxu0 %v2097_v14  ;;  %2023 = vmatpush1.bf16.msra.mxu1 %v2097_v14  ;;  %v2194_v14 = vld [vmem:[%s2384_s19 + $0x1f4] ss:$8 sps:$4 sm:$0xff]  }
  0x3d   : > { %803 = vmatprep.subr.bf16.mxu0 %v2278_v1  ;;  %2008 = vmatprep.subr.bf16.mxu1 %v2278_v1 }
  0x40   : > { %804 = vmatpush1.bf16.msra.mxu0 %v2098_v15  ;;  %2024 = vmatpush1.bf16.msra.mxu1 %v2098_v15  ;;  %v2196_v15 = vld [vmem:[%s2384_s19 + $0xf0] ss:$8 sps:$4 sm:$0xff]  }
  0x41   : > { %805 = vmatprep.subr.bf16.mxu0 %v2278_v1  ;;  %2009 = vmatprep.subr.bf16.mxu1 %v2278_v1 }
  0x44   : > { %806 = vmatpush1.bf16.msra.mxu0 %v2099_v16  ;;  %2025 = vmatpush1.bf16.msra.mxu1 %v2099_v16  ;;  %v2197_v16 = vld [vmem:[%s2384_s19 + $0x1f0] ss:$8 sps:$4 sm:$0xff]  }
  0x45   : > { %807 = vmatprep.subr.bf16.mxu0 %v2278_v1  ;;  %2010 = vmatprep.subr.bf16.mxu1 %v2278_v1 }
  0x48   : > { %808 = vmatpush1.bf16.msra.mxu0 %v2100_v17  ;;  %2026 = vmatpush1.bf16.msra.mxu1 %v2100_v17  ;;  %v2510_v17 = vld [vmem:[%s2672_s2] ss:$0 sm:$0xff] }
  0x49   : > { %809 = vmatprep.subr.bf16.mxu0 %v2278_v1  ;;  %2011 = vmatprep.subr.bf16.mxu1 %v2278_v1  ;;  %v2174_v1 = vld [vmem:[%s2384_s19 + $0xc4] ss:$8 sps:$4 sm:$0xff]   ;;  %s1585_s19 = sshll.u32 %s231_s5, 8 }
  0x4a   : > { %s2519_s6 = scalar_lea.vmem [#allocation2], %s1585_s19 }
  0x4b   : > { %s1467_s8 = sshll.u32 %s2519_s6, 4  ;;  %s2618_s8 = int_to_ptr.vmem [resolvable:$true] %s1467_s8 }
  0x4c   : > { %810 = vmatpush1.bf16.msra.mxu0 %v2101_v18  ;;  %2027 = vmatpush1.bf16.msra.mxu1 %v2101_v18  ;;  %s2198_s18 = scalar_lea.vmem %s2618_s8, 4096  ;;  %p2205_p1 = scmp.lt.s32.totalorder %s2618_s8, %s2203_s23 }
  0x4d   : > { %p2199_p12 = scmp.ne.s32.totalorder %s2618_s8, %s2198_s18  ;;  %p2206_p2 = scmp.lt.s32.totalorder %s2204_s26, %s2198_s18 }
  0x4f   : > { %812 = vmatmul.mubr.bf16.vlgmr.msra.gmra.mrb[0].mxu0 %v2102_v19  ;;  %940 = vmatmul.mubr.bf16.vlgmr.msra.gmra.mrb[0].mxu1 %v2105_v20  ;;  %p2200_p13 = pnand %p2199_p12, %p2342_p4  ;;  %p2207_p3 = por %p2206_p2, %p2205_p1 }
  0x50   : > { %819 = vmatprep.mubr.bf16.mxu0 %v2108_v21  ;;  %947 = vmatprep.mubr.bf16.mxu1 %v2110_v22 }
  0x51   : > { %p2201_p0 = pneg %p2200_p13 }
  0x53   : > { %p2208_p5 = pnand %p2207_p3, %p2201_p0 }
  0x57   : > { %820 = vmatmul.mubr.bf16.gmra.mrb[4].mxu0 %v2112_v23  ;;  %948 = vmatmul.mubr.bf16.gmra.mrb[4].mxu1 %v2113_v24 }
  0x58   : > { %827 = vmatprep.mubr.bf16.mxu0 %v2114_v25  ;;  %955 = vmatprep.mubr.bf16.mxu1 %v2116_v26 }
  0x5f   : > { %828 = vmatmul.mubr.bf16.gmra.mrb[8].mxu0 %v2118_v27  ;;  %956 = vmatmul.mubr.bf16.gmra.mrb[8].mxu1 %v2119_v28 }
  0x60   : > { %835 = vmatprep.mubr.bf16.mxu0 %v2120_v29  ;;  %963 = vmatprep.mubr.bf16.mxu1 %v2122_v30 }
  0x67   : > { %836 = vmatmul.mubr.bf16.gmra.mrb[12].mxu0 %v2124_v31  ;;  %964 = vmatmul.mubr.bf16.gmra.mrb[12].mxu1 %v2125_v32 }
  0x68   : > { %843 = vmatprep.mubr.bf16.mxu0 %v2126_v33  ;;  %971 = vmatprep.mubr.bf16.mxu1 %v2128_v34 }
  0x6f   : > { %844 = vmatmul.mubr.bf16.gmra.mrb[16].mxu0 %v2130_v35  ;;  %972 = vmatmul.mubr.bf16.gmra.mrb[16].mxu1 %v2131_v36 }
  0x70   : > { %851 = vmatprep.mubr.bf16.mxu0 %v2132_v37  ;;  %979 = vmatprep.mubr.bf16.mxu1 %v2134_v38 }
  0x77   : > { %852 = vmatmul.mubr.bf16.gmra.mrb[20].mxu0 %v2136_v39  ;;  %980 = vmatmul.mubr.bf16.gmra.mrb[20].mxu1 %v2137_v40 }
  0x78   : > { %859 = vmatprep.mubr.bf16.mxu0 %v2138_v41  ;;  %987 = vmatprep.mubr.bf16.mxu1 %v2140_v42 }
  0x7f   : > { %860 = vmatmul.mubr.bf16.gmra.mrb[24].mxu0 %v2142_v43  ;;  %988 = vmatmul.mubr.bf16.gmra.mrb[24].mxu1 %v2143_v44 }
  0x80   : > { %867 = vmatprep.mubr.bf16.mxu0 %v2144_v45  ;;  %995 = vmatprep.mubr.bf16.mxu1 %v2146_v46 }
  0x87   : > { %868 = vmatmul.mubr.bf16.gmra.mrb[28].mxu0 %v2148_v47  ;;  %996 = vmatmul.mubr.bf16.gmra.mrb[28].mxu1 %v2149_v48 }
  0x88   : > { %875 = vmatprep.mubr.bf16.mxu0 %v2150_v49  ;;  %1003 = vmatprep.mubr.bf16.mxu1 %v2152_v50 }
  0x8f   : > { %876 = vmatmul.mubr.bf16.gmra.mrb[32].mxu0 %v2154_v51  ;;  %1004 = vmatmul.mubr.bf16.gmra.mrb[32].mxu1 %v2155_v52 }
  0x90   : > { %883 = vmatprep.mubr.bf16.mxu0 %v2156_v53  ;;  %1011 = vmatprep.mubr.bf16.mxu1 %v2158_v54 }
  0x97   : > { %884 = vmatmul.mubr.bf16.gmra.mrb[36].mxu0 %v2160_v55  ;;  %1012 = vmatmul.mubr.bf16.gmra.mrb[36].mxu1 %v2161_v56 }
  0x98   : > { %891 = vmatprep.mubr.bf16.mxu0 %v2162_v57  ;;  %1019 = vmatprep.mubr.bf16.mxu1 %v2164_v58 }
  0x9f   : > { %892 = vmatmul.mubr.bf16.gmra.mrb[40].mxu0 %v2166_v59  ;;  %1020 = vmatmul.mubr.bf16.gmra.mrb[40].mxu1 %v2167_v60 }
  0xa0   : > { %899 = vmatprep.mubr.bf16.mxu0 %v2168_v61  ;;  %1027 = vmatprep.mubr.bf16.mxu1 %v2170_v62 }
  0xa7   : > { %900 = vmatmul.mubr.bf16.gmra.mrb[44].mxu0 %v2172_v63  ;;  %1028 = vmatmul.mubr.bf16.gmra.mrb[44].mxu1 %v2173_v0 }
  0xa8   : > { %907 = vmatprep.mubr.bf16.mxu0 %v2174_v1  ;;  %1035 = vmatprep.mubr.bf16.mxu1 %v2176_v2 }
  0xaf   : > { %908 = vmatmul.mubr.bf16.gmra.mrb[48].mxu0 %v2178_v3  ;;  %1036 = vmatmul.mubr.bf16.gmra.mrb[48].mxu1 %v2179_v4 }
  0xb0   : > { %915 = vmatprep.mubr.bf16.mxu0 %v2180_v5  ;;  %1043 = vmatprep.mubr.bf16.mxu1 %v2182_v6 }
  0xb7   : > { %916 = vmatmul.mubr.bf16.gmra.mrb[52].mxu0 %v2184_v7  ;;  %1044 = vmatmul.mubr.bf16.gmra.mrb[52].mxu1 %v2185_v8 }
  0xb8   : > { %923 = vmatprep.mubr.bf16.mxu0 %v2186_v9  ;;  %1051 = vmatprep.mubr.bf16.mxu1 %v2188_v10 }
  0xbf   : > { %924 = vmatmul.mubr.bf16.gmra.mrb[56].mxu0 %v2190_v11  ;;  %1052 = vmatmul.mubr.bf16.gmra.mrb[56].mxu1 %v2191_v12 }
  0xc0   : > { %931 = vmatprep.mubr.bf16.mxu0 %v2192_v13  ;;  %1059 = vmatprep.mubr.bf16.mxu1 %v2194_v14 }
  0xc7   : > { %932 = vmatmul.mubr.bf16.gmra.mrb[60].mxu0 %v2196_v15  ;;  %1060 = vmatmul.mubr.bf16.gmra.mrb[60].mxu1 %v2197_v16 }
 0x122   : > { %v813_v18 = vpop.f32.mrb[0].mxu0  ;;  %v941_v19 = vpop.f32.mrb[0].mxu1 }
 0x123   : > { %v814_v20 = vadd.f32 %v2510_v17, %v813_v18  ;;  %v942_v21 = vadd.f32 %v2510_v17, %v941_v19  ;;  %v815_v22 = vpop.f32.mrb[1].mxu0  ;;  %v943_v23 = vpop.f32.mrb[1].mxu1 }
 0x124   : > { %v816_v24 = vpop.f32.mrb[2].mxu0  ;;  %v944_v25 = vpop.f32.mrb[2].mxu1 }
 0x125   : > { %v817_v26 = vadd.f32 %v2510_v17, %v816_v24  ;;  %v945_v27 = vadd.f32 %v2510_v17, %v944_v25  ;;  %v818_v28 = vpop.f32.mrb[3].mxu0  ;;  %v946_v29 = vpop.f32.mrb[3].mxu1  ;;  %v1068_v30 = vmax.f32 %v814_v20, 0.0  ;;  %v1100_v31 = vmax.f32 %v942_v21, 0.0 }
 0x127   : > { %v1069_v32 = vmax.f32 %v817_v26, 0.0  ;;  %v1101_v33 = vmax.f32 %v945_v27, 0.0 }
 0x129   : > { %v1808_v34 = vpack.c.bf16 %v1069_v32, %v1068_v30  ;;  %v1888_v35 = vpack.c.bf16 %v1101_v33, %v1100_v31 }
 0x12a   : > { %v821_v36 = vpop.f32.mrb[4].mxu0  ;;  %v949_v37 = vpop.f32.mrb[4].mxu1 }
 0x12b   : > { %1809 = vst [vmem:[%s2519_s6] sm:$0xff] %v1808_v34   ;;  %1980 = vst [vmem:[%s2519_s6 + $0x80] sm:$0xff] %v1888_v35   ;;  %v822_v38 = vadd.f32 %v2510_v17, %v821_v36  ;;  %v950_v39 = vadd.f32 %v2510_v17, %v949_v37  ;;  %v823_v40 = vpop.f32.mrb[5].mxu0  ;;  %v951_v41 = vpop.f32.mrb[5].mxu1 }
 0x12c   : > { %v824_v42 = vpop.f32.mrb[6].mxu0  ;;  %v952_v43 = vpop.f32.mrb[6].mxu1 }
 0x12d   : > { %v825_v44 = vadd.f32 %v2510_v17, %v824_v42  ;;  %v953_v45 = vadd.f32 %v2510_v17, %v952_v43  ;;  %v826_v46 = vpop.f32.mrb[7].mxu0  ;;  %v954_v47 = vpop.f32.mrb[7].mxu1  ;;  %v1070_v48 = vmax.f32 %v822_v38, 0.0  ;;  %v1102_v49 = vmax.f32 %v950_v39, 0.0 }
 0x12f   : > { %v1071_v50 = vmax.f32 %v825_v44, 0.0  ;;  %v1103_v51 = vmax.f32 %v953_v45, 0.0 }
 0x131   : > { %v1813_v52 = vpack.c.bf16 %v1071_v50, %v1070_v48  ;;  %v1893_v53 = vpack.c.bf16 %v1103_v51, %v1102_v49 }
 0x132   : > { %v829_v54 = vpop.f32.mrb[8].mxu0  ;;  %v957_v55 = vpop.f32.mrb[8].mxu1 }
 0x133   : > { %1965 = vst [vmem:[%s2519_s6 + $0x8] sm:$0xff] %v1813_v52   ;;  %1981 = vst [vmem:[%s2519_s6 + $0x88] sm:$0xff] %v1893_v53   ;;  %v830_v56 = vadd.f32 %v2510_v17, %v829_v54  ;;  %v958_v57 = vadd.f32 %v2510_v17, %v957_v55  ;;  %v831_v58 = vpop.f32.mrb[9].mxu0  ;;  %v959_v59 = vpop.f32.mrb[9].mxu1 }
 0x134   : > { %v832_v60 = vpop.f32.mrb[10].mxu0  ;;  %v960_v61 = vpop.f32.mrb[10].mxu1 }
 0x135   : > { %v833_v62 = vadd.f32 %v2510_v17, %v832_v60  ;;  %v961_v63 = vadd.f32 %v2510_v17, %v960_v61  ;;  %v834_v0 = vpop.f32.mrb[11].mxu0  ;;  %v962_v1 = vpop.f32.mrb[11].mxu1  ;;  %v1072_v2 = vmax.f32 %v830_v56, 0.0  ;;  %v1104_v3 = vmax.f32 %v958_v57, 0.0 }
 0x137   : > { %v1073_v4 = vmax.f32 %v833_v62, 0.0  ;;  %v1105_v5 = vmax.f32 %v961_v63, 0.0 }
 0x139   : > { %v1818_v6 = vpack.c.bf16 %v1073_v4, %v1072_v2  ;;  %v1898_v7 = vpack.c.bf16 %v1105_v5, %v1104_v3 }
 0x13a   : > { %v837_v8 = vpop.f32.mrb[12].mxu0  ;;  %v965_v9 = vpop.f32.mrb[12].mxu1 }
 0x13b   : > { %1966 = vst [vmem:[%s2519_s6 + $0x10] sm:$0xff] %v1818_v6   ;;  %1982 = vst [vmem:[%s2519_s6 + $0x90] sm:$0xff] %v1898_v7   ;;  %v838_v10 = vadd.f32 %v2510_v17, %v837_v8  ;;  %v966_v11 = vadd.f32 %v2510_v17, %v965_v9  ;;  %v839_v12 = vpop.f32.mrb[13].mxu0  ;;  %v967_v13 = vpop.f32.mrb[13].mxu1 }
 0x13c   : > { %v840_v14 = vpop.f32.mrb[14].mxu0  ;;  %v968_v15 = vpop.f32.mrb[14].mxu1 }
 0x13d   : > { %v841_v16 = vadd.f32 %v2510_v17, %v840_v14  ;;  %v969_v18 = vadd.f32 %v2510_v17, %v968_v15  ;;  %v842_v19 = vpop.f32.mrb[15].mxu0  ;;  %v970_v20 = vpop.f32.mrb[15].mxu1  ;;  %v1074_v21 = vmax.f32 %v838_v10, 0.0  ;;  %v1106_v22 = vmax.f32 %v966_v11, 0.0 }
 0x13f   : > { %v1075_v23 = vmax.f32 %v841_v16, 0.0  ;;  %v1107_v24 = vmax.f32 %v969_v18, 0.0 }
 0x141   : > { %v1823_v25 = vpack.c.bf16 %v1075_v23, %v1074_v21  ;;  %v1903_v26 = vpack.c.bf16 %v1107_v24, %v1106_v22 }
 0x142   : > { %v845_v27 = vpop.f32.mrb[16].mxu0  ;;  %v973_v28 = vpop.f32.mrb[16].mxu1 }
 0x143   : > { %1967 = vst [vmem:[%s2519_s6 + $0x18] sm:$0xff] %v1823_v25   ;;  %1983 = vst [vmem:[%s2519_s6 + $0x98] sm:$0xff] %v1903_v26   ;;  %v846_v29 = vadd.f32 %v2510_v17, %v845_v27  ;;  %v974_v30 = vadd.f32 %v2510_v17, %v973_v28  ;;  %v847_v31 = vpop.f32.mrb[17].mxu0  ;;  %v975_v32 = vpop.f32.mrb[17].mxu1 }
 0x144   : > { %v848_v33 = vpop.f32.mrb[18].mxu0  ;;  %v976_v34 = vpop.f32.mrb[18].mxu1 }
 0x145   : > { %v849_v35 = vadd.f32 %v2510_v17, %v848_v33  ;;  %v977_v36 = vadd.f32 %v2510_v17, %v976_v34  ;;  %v850_v37 = vpop.f32.mrb[19].mxu0  ;;  %v978_v38 = vpop.f32.mrb[19].mxu1  ;;  %v1076_v39 = vmax.f32 %v846_v29, 0.0  ;;  %v1108_v40 = vmax.f32 %v974_v30, 0.0 }
 0x147   : > { %v1077_v41 = vmax.f32 %v849_v35, 0.0  ;;  %v1109_v42 = vmax.f32 %v977_v36, 0.0 }
 0x149   : > { %v1828_v43 = vpack.c.bf16 %v1077_v41, %v1076_v39  ;;  %v1908_v44 = vpack.c.bf16 %v1109_v42, %v1108_v40 }
 0x14a   : > { %v853_v45 = vpop.f32.mrb[20].mxu0  ;;  %v981_v46 = vpop.f32.mrb[20].mxu1 }
 0x14b   : > { %1968 = vst [vmem:[%s2519_s6 + $0x20] sm:$0xff] %v1828_v43   ;;  %1984 = vst [vmem:[%s2519_s6 + $0xa0] sm:$0xff] %v1908_v44   ;;  %v854_v47 = vadd.f32 %v2510_v17, %v853_v45  ;;  %v982_v48 = vadd.f32 %v2510_v17, %v981_v46  ;;  %v855_v49 = vpop.f32.mrb[21].mxu0  ;;  %v983_v50 = vpop.f32.mrb[21].mxu1 }
 0x14c   : > { %v856_v51 = vpop.f32.mrb[22].mxu0  ;;  %v984_v52 = vpop.f32.mrb[22].mxu1 }
 0x14d   : > { %v857_v53 = vadd.f32 %v2510_v17, %v856_v51  ;;  %v985_v54 = vadd.f32 %v2510_v17, %v984_v52  ;;  %v858_v55 = vpop.f32.mrb[23].mxu0  ;;  %v986_v56 = vpop.f32.mrb[23].mxu1  ;;  %v1078_v57 = vmax.f32 %v854_v47, 0.0  ;;  %v1110_v58 = vmax.f32 %v982_v48, 0.0 }
 0x14f   : > { %v1079_v59 = vmax.f32 %v857_v53, 0.0  ;;  %v1111_v60 = vmax.f32 %v985_v54, 0.0 }
 0x151   : > { %v1833_v61 = vpack.c.bf16 %v1079_v59, %v1078_v57  ;;  %v1913_v62 = vpack.c.bf16 %v1111_v60, %v1110_v58 }
 0x152   : > { %v861_v63 = vpop.f32.mrb[24].mxu0  ;;  %v989_v0 = vpop.f32.mrb[24].mxu1 }
 0x153   : > { %1969 = vst [vmem:[%s2519_s6 + $0x28] sm:$0xff] %v1833_v61   ;;  %1985 = vst [vmem:[%s2519_s6 + $0xa8] sm:$0xff] %v1913_v62   ;;  %v862_v1 = vadd.f32 %v2510_v17, %v861_v63  ;;  %v990_v2 = vadd.f32 %v2510_v17, %v989_v0  ;;  %v863_v3 = vpop.f32.mrb[25].mxu0  ;;  %v991_v4 = vpop.f32.mrb[25].mxu1 }
 0x154   : > { %v864_v5 = vpop.f32.mrb[26].mxu0  ;;  %v992_v6 = vpop.f32.mrb[26].mxu1 }
 0x155   : > { %v865_v7 = vadd.f32 %v2510_v17, %v864_v5  ;;  %v993_v8 = vadd.f32 %v2510_v17, %v992_v6  ;;  %v866_v9 = vpop.f32.mrb[27].mxu0  ;;  %v994_v10 = vpop.f32.mrb[27].mxu1  ;;  %v1080_v11 = vmax.f32 %v862_v1, 0.0  ;;  %v1112_v12 = vmax.f32 %v990_v2, 0.0 }
 0x157   : > { %v1081_v13 = vmax.f32 %v865_v7, 0.0  ;;  %v1113_v14 = vmax.f32 %v993_v8, 0.0 }
 0x159   : > { %v1838_v15 = vpack.c.bf16 %v1081_v13, %v1080_v11  ;;  %v1918_v16 = vpack.c.bf16 %v1113_v14, %v1112_v12 }
 0x15a   : > { %v869_v18 = vpop.f32.mrb[28].mxu0  ;;  %v997_v19 = vpop.f32.mrb[28].mxu1 }
 0x15b   : > { %1970 = vst [vmem:[%s2519_s6 + $0x30] sm:$0xff] %v1838_v15   ;;  %1986 = vst [vmem:[%s2519_s6 + $0xb0] sm:$0xff] %v1918_v16   ;;  %v870_v20 = vadd.f32 %v2510_v17, %v869_v18  ;;  %v998_v21 = vadd.f32 %v2510_v17, %v997_v19  ;;  %v871_v22 = vpop.f32.mrb[29].mxu0  ;;  %v999_v23 = vpop.f32.mrb[29].mxu1 }
 0x15c   : > { %v872_v24 = vpop.f32.mrb[30].mxu0  ;;  %v1000_v25 = vpop.f32.mrb[30].mxu1 }
 0x15d   : > { %v873_v26 = vadd.f32 %v2510_v17, %v872_v24  ;;  %v1001_v27 = vadd.f32 %v2510_v17, %v1000_v25  ;;  %v874_v28 = vpop.f32.mrb[31].mxu0  ;;  %v1002_v29 = vpop.f32.mrb[31].mxu1  ;;  %v1082_v30 = vmax.f32 %v870_v20, 0.0  ;;  %v1114_v31 = vmax.f32 %v998_v21, 0.0 }
 0x15f   : > { %v1083_v32 = vmax.f32 %v873_v26, 0.0  ;;  %v1115_v33 = vmax.f32 %v1001_v27, 0.0 }
 0x161   : > { %v1843_v34 = vpack.c.bf16 %v1083_v32, %v1082_v30  ;;  %v1923_v35 = vpack.c.bf16 %v1115_v33, %v1114_v31 }
 0x162   : > { %v877_v36 = vpop.f32.mrb[32].mxu0  ;;  %v1005_v37 = vpop.f32.mrb[32].mxu1 }
 0x163   : > { %1971 = vst [vmem:[%s2519_s6 + $0x38] sm:$0xff] %v1843_v34   ;;  %1987 = vst [vmem:[%s2519_s6 + $0xb8] sm:$0xff] %v1923_v35   ;;  %v878_v38 = vadd.f32 %v2510_v17, %v877_v36  ;;  %v1006_v39 = vadd.f32 %v2510_v17, %v1005_v37  ;;  %v879_v40 = vpop.f32.mrb[33].mxu0  ;;  %v1007_v41 = vpop.f32.mrb[33].mxu1 }
 0x164   : > { %v880_v42 = vpop.f32.mrb[34].mxu0  ;;  %v1008_v43 = vpop.f32.mrb[34].mxu1 }
 0x165   : > { %v881_v44 = vadd.f32 %v2510_v17, %v880_v42  ;;  %v1009_v45 = vadd.f32 %v2510_v17, %v1008_v43  ;;  %v882_v46 = vpop.f32.mrb[35].mxu0  ;;  %v1010_v47 = vpop.f32.mrb[35].mxu1  ;;  %v1084_v48 = vmax.f32 %v878_v38, 0.0  ;;  %v1116_v49 = vmax.f32 %v1006_v39, 0.0 }
 0x167   : > { %v1085_v50 = vmax.f32 %v881_v44, 0.0  ;;  %v1117_v51 = vmax.f32 %v1009_v45, 0.0 }
 0x169   : > { %v1848_v52 = vpack.c.bf16 %v1085_v50, %v1084_v48  ;;  %v1928_v53 = vpack.c.bf16 %v1117_v51, %v1116_v49 }
 0x16a   : > { %v885_v54 = vpop.f32.mrb[36].mxu0  ;;  %v1013_v55 = vpop.f32.mrb[36].mxu1 }
 0x16b   : > { %1972 = vst [vmem:[%s2519_s6 + $0x40] sm:$0xff] %v1848_v52   ;;  %1988 = vst [vmem:[%s2519_s6 + $0xc0] sm:$0xff] %v1928_v53   ;;  %v886_v56 = vadd.f32 %v2510_v17, %v885_v54  ;;  %v1014_v57 = vadd.f32 %v2510_v17, %v1013_v55  ;;  %v887_v58 = vpop.f32.mrb[37].mxu0  ;;  %v1015_v59 = vpop.f32.mrb[37].mxu1 }
 0x16c   : > { %v888_v60 = vpop.f32.mrb[38].mxu0  ;;  %v1016_v61 = vpop.f32.mrb[38].mxu1 }
 0x16d   : > { %v889_v62 = vadd.f32 %v2510_v17, %v888_v60  ;;  %v1017_v63 = vadd.f32 %v2510_v17, %v1016_v61  ;;  %v890_v0 = vpop.f32.mrb[39].mxu0  ;;  %v1018_v1 = vpop.f32.mrb[39].mxu1  ;;  %v1086_v2 = vmax.f32 %v886_v56, 0.0  ;;  %v1118_v3 = vmax.f32 %v1014_v57, 0.0 }
 0x16f   : > { %v1087_v4 = vmax.f32 %v889_v62, 0.0  ;;  %v1119_v5 = vmax.f32 %v1017_v63, 0.0 }
 0x171   : > { %v1853_v6 = vpack.c.bf16 %v1087_v4, %v1086_v2  ;;  %v1933_v7 = vpack.c.bf16 %v1119_v5, %v1118_v3 }
 0x172   : > { %v893_v8 = vpop.f32.mrb[40].mxu0  ;;  %v1021_v9 = vpop.f32.mrb[40].mxu1 }
 0x173   : > { %1973 = vst [vmem:[%s2519_s6 + $0x48] sm:$0xff] %v1853_v6   ;;  %1989 = vst [vmem:[%s2519_s6 + $0xc8] sm:$0xff] %v1933_v7   ;;  %v894_v10 = vadd.f32 %v2510_v17, %v893_v8  ;;  %v1022_v11 = vadd.f32 %v2510_v17, %v1021_v9  ;;  %v895_v12 = vpop.f32.mrb[41].mxu0  ;;  %v1023_v13 = vpop.f32.mrb[41].mxu1 }
 0x174   : > { %v896_v14 = vpop.f32.mrb[42].mxu0  ;;  %v1024_v15 = vpop.f32.mrb[42].mxu1 }
 0x175   : > { %v897_v16 = vadd.f32 %v2510_v17, %v896_v14  ;;  %v1025_v18 = vadd.f32 %v2510_v17, %v1024_v15  ;;  %v898_v19 = vpop.f32.mrb[43].mxu0  ;;  %v1026_v20 = vpop.f32.mrb[43].mxu1  ;;  %v1088_v21 = vmax.f32 %v894_v10, 0.0  ;;  %v1120_v22 = vmax.f32 %v1022_v11, 0.0 }
 0x177   : > { %v1089_v23 = vmax.f32 %v897_v16, 0.0  ;;  %v1121_v24 = vmax.f32 %v1025_v18, 0.0 }
 0x179   : > { %v1858_v25 = vpack.c.bf16 %v1089_v23, %v1088_v21  ;;  %v1938_v26 = vpack.c.bf16 %v1121_v24, %v1120_v22 }
 0x17a   : > { %v901_v27 = vpop.f32.mrb[44].mxu0  ;;  %v1029_v28 = vpop.f32.mrb[44].mxu1 }
 0x17b   : > { %1974 = vst [vmem:[%s2519_s6 + $0x50] sm:$0xff] %v1858_v25   ;;  %1990 = vst [vmem:[%s2519_s6 + $0xd0] sm:$0xff] %v1938_v26   ;;  %v902_v29 = vadd.f32 %v2510_v17, %v901_v27  ;;  %v1030_v30 = vadd.f32 %v2510_v17, %v1029_v28  ;;  %v903_v31 = vpop.f32.mrb[45].mxu0  ;;  %v1031_v32 = vpop.f32.mrb[45].mxu1 }
 0x17c   : > { %v904_v33 = vpop.f32.mrb[46].mxu0  ;;  %v1032_v34 = vpop.f32.mrb[46].mxu1 }
 0x17d   : > { %v905_v35 = vadd.f32 %v2510_v17, %v904_v33  ;;  %v1033_v36 = vadd.f32 %v2510_v17, %v1032_v34  ;;  %v906_v37 = vpop.f32.mrb[47].mxu0  ;;  %v1034_v38 = vpop.f32.mrb[47].mxu1  ;;  %v1090_v39 = vmax.f32 %v902_v29, 0.0  ;;  %v1122_v40 = vmax.f32 %v1030_v30, 0.0 }
 0x17f   : > { %v1091_v41 = vmax.f32 %v905_v35, 0.0  ;;  %v1123_v42 = vmax.f32 %v1033_v36, 0.0 }
 0x181   : > { %v1863_v43 = vpack.c.bf16 %v1091_v41, %v1090_v39  ;;  %v1943_v44 = vpack.c.bf16 %v1123_v42, %v1122_v40 }
 0x182   : > { %v909_v45 = vpop.f32.mrb[48].mxu0  ;;  %v1037_v46 = vpop.f32.mrb[48].mxu1 }
 0x183   : > { %1975 = vst [vmem:[%s2519_s6 + $0x58] sm:$0xff] %v1863_v43   ;;  %1991 = vst [vmem:[%s2519_s6 + $0xd8] sm:$0xff] %v1943_v44   ;;  %v910_v47 = vadd.f32 %v2510_v17, %v909_v45  ;;  %v1038_v48 = vadd.f32 %v2510_v17, %v1037_v46  ;;  %v911_v49 = vpop.f32.mrb[49].mxu0  ;;  %v1039_v50 = vpop.f32.mrb[49].mxu1 }
 0x184   : > { %v912_v51 = vpop.f32.mrb[50].mxu0  ;;  %v1040_v52 = vpop.f32.mrb[50].mxu1 }
 0x185   : > { %v913_v53 = vadd.f32 %v2510_v17, %v912_v51  ;;  %v1041_v54 = vadd.f32 %v2510_v17, %v1040_v52  ;;  %v914_v55 = vpop.f32.mrb[51].mxu0  ;;  %v1042_v56 = vpop.f32.mrb[51].mxu1  ;;  %v1092_v57 = vmax.f32 %v910_v47, 0.0  ;;  %v1124_v58 = vmax.f32 %v1038_v48, 0.0 }
 0x187   : > { %v1093_v59 = vmax.f32 %v913_v53, 0.0  ;;  %v1125_v60 = vmax.f32 %v1041_v54, 0.0 }
 0x189   : > { %v1868_v61 = vpack.c.bf16 %v1093_v59, %v1092_v57  ;;  %v1948_v62 = vpack.c.bf16 %v1125_v60, %v1124_v58 }
 0x18a   : > { %v917_v63 = vpop.f32.mrb[52].mxu0  ;;  %v1045_v0 = vpop.f32.mrb[52].mxu1 }
 0x18b   : > { %1976 = vst [vmem:[%s2519_s6 + $0x60] sm:$0xff] %v1868_v61   ;;  %1992 = vst [vmem:[%s2519_s6 + $0xe0] sm:$0xff] %v1948_v62   ;;  %v918_v1 = vadd.f32 %v2510_v17, %v917_v63  ;;  %v1046_v2 = vadd.f32 %v2510_v17, %v1045_v0  ;;  %v919_v3 = vpop.f32.mrb[53].mxu0  ;;  %v1047_v4 = vpop.f32.mrb[53].mxu1 }
 0x18c   : > { %v920_v5 = vpop.f32.mrb[54].mxu0  ;;  %v1048_v6 = vpop.f32.mrb[54].mxu1 }
 0x18d   : > { %v921_v7 = vadd.f32 %v2510_v17, %v920_v5  ;;  %v1049_v8 = vadd.f32 %v2510_v17, %v1048_v6  ;;  %v922_v9 = vpop.f32.mrb[55].mxu0  ;;  %v1050_v10 = vpop.f32.mrb[55].mxu1  ;;  %v1094_v11 = vmax.f32 %v918_v1, 0.0  ;;  %v1126_v12 = vmax.f32 %v1046_v2, 0.0 }
 0x18f   : > { %v1095_v13 = vmax.f32 %v921_v7, 0.0  ;;  %v1127_v14 = vmax.f32 %v1049_v8, 0.0 }
 0x191   : > { %v1873_v15 = vpack.c.bf16 %v1095_v13, %v1094_v11  ;;  %v1953_v16 = vpack.c.bf16 %v1127_v14, %v1126_v12 }
 0x192   : > { %v925_v18 = vpop.f32.mrb[56].mxu0  ;;  %v1053_v19 = vpop.f32.mrb[56].mxu1 }
 0x193   : > { %1977 = vst [vmem:[%s2519_s6 + $0x68] sm:$0xff] %v1873_v15   ;;  %1993 = vst [vmem:[%s2519_s6 + $0xe8] sm:$0xff] %v1953_v16   ;;  %v926_v20 = vadd.f32 %v2510_v17, %v925_v18  ;;  %v1054_v21 = vadd.f32 %v2510_v17, %v1053_v19  ;;  %v927_v22 = vpop.f32.mrb[57].mxu0  ;;  %v1055_v23 = vpop.f32.mrb[57].mxu1 }
 0x194   : > { %v928_v24 = vpop.f32.mrb[58].mxu0  ;;  %v1056_v25 = vpop.f32.mrb[58].mxu1 }
 0x195   : > { %v929_v26 = vadd.f32 %v2510_v17, %v928_v24  ;;  %v1057_v27 = vadd.f32 %v2510_v17, %v1056_v25  ;;  %v930_v28 = vpop.f32.mrb[59].mxu0  ;;  %v1058_v29 = vpop.f32.mrb[59].mxu1  ;;  %v1096_v30 = vmax.f32 %v926_v20, 0.0  ;;  %v1128_v31 = vmax.f32 %v1054_v21, 0.0 }
 0x197   : > { %v1097_v32 = vmax.f32 %v929_v26, 0.0  ;;  %v1129_v33 = vmax.f32 %v1057_v27, 0.0 }
 0x199   : > { %v1878_v34 = vpack.c.bf16 %v1097_v32, %v1096_v30  ;;  %v1958_v35 = vpack.c.bf16 %v1129_v33, %v1128_v31 }
 0x19a   : > { %v933_v36 = vpop.f32.mrb[60].mxu0  ;;  %v1061_v37 = vpop.f32.mrb[60].mxu1 }
 0x19b   : > { %1978 = vst [vmem:[%s2519_s6 + $0x70] sm:$0xff] %v1878_v34   ;;  %1994 = vst [vmem:[%s2519_s6 + $0xf0] sm:$0xff] %v1958_v35   ;;  %v934_v38 = vadd.f32 %v2510_v17, %v933_v36  ;;  %v1062_v39 = vadd.f32 %v2510_v17, %v1061_v37  ;;  %v935_v40 = vpop.f32.mrb[61].mxu0  ;;  %v1063_v41 = vpop.f32.mrb[61].mxu1 }
 0x19c   : > { %v936_v42 = vpop.f32.mrb[62].mxu0  ;;  %v1064_v43 = vpop.f32.mrb[62].mxu1 }
 0x19d   : > { %v937_v44 = vadd.f32 %v2510_v17, %v936_v42  ;;  %v1065_v45 = vadd.f32 %v2510_v17, %v1064_v43  ;;  %v938_v46 = vpop.f32.mrb[63].mxu0  ;;  %v1066_v47 = vpop.f32.mrb[63].mxu1  ;;  %v1098_v48 = vmax.f32 %v934_v38, 0.0  ;;  %v1130_v49 = vmax.f32 %v1062_v39, 0.0 }
 0x19f   : > { %v1099_v50 = vmax.f32 %v937_v44, 0.0  ;;  %v1131_v51 = vmax.f32 %v1065_v45, 0.0 }
 0x1a1   : > { %v1883_v17 = vpack.c.bf16 %v1099_v50, %v1098_v48  ;;  %v1963_v52 = vpack.c.bf16 %v1131_v51, %v1130_v49 }
 0x1a3   : > { %1979 = vst [vmem:[%s2519_s6 + $0x78] sm:$0xff] %v1883_v17   ;;  %1995 = vst [vmem:[%s2519_s6 + $0xf8] sm:$0xff] %v1963_v52  }
 0x1a4   : > { %2211 = shalt.err (!%p2208_p5)
}
 0x1a5   : > { %s2212_s27 = scalar_lea.hbm %s2616_s11, 4096  ;;  %s2216_s30 = scalar_lea.hbm %s2673_s3, 16384 }
 0x1a6   : > { %p2213_p6 = scmp.ne.s32.totalorder %s2616_s11, %s2212_s27  ;;  %p2217_p10 = scmp.lt.u32.totalorder %s2616_s11, %s2673_s3 }
 0x1a7   : > { %p2218_p11 = scmp.lt.u32.totalorder %s2216_s30, %s2212_s27  ;;  %p2220_p13 = scmp.lt.u32.totalorder %s2212_s27, %s2616_s11 }
 0x1a8   : > { %p2214_p7 = pnand %p2213_p6, %p2342_p4 }
 0x1a9   : > { %p2219_p12 = por %p2218_p11, %p2217_p10 }
 0x1aa   : > { %p2215_p9 = pneg %p2214_p7 }
 0x1ab   : > { %p2221_p0 = por %p2220_p13, %p2219_p12 }
 0x1ad   : > { %p2222_p1 = pnand %p2221_p0, %p2215_p9 }
 0x1af   : > { %2225 = shalt.err (!%p2222_p1)
}
 0x1b0   : > { %s2280_s19 = smov 64   ;;  %s2281_s6 = smov 4  }
 0x1b1   : > { %2028 = dma.vmem_to_hbm [thread:$0]  (%p2342_p4), %s2618_s8, 4096, %s2616_s11, %s2624_s15, %s2280_s19, %s2280_s19, %s2281_s6  }
 0x1b2 PF: > { %p2034_p2 = scmp.ge.s32.totalorder %s2276_s17, 2  ;;  %s1482_s7 = sand.u32 1, %s2256_s12  }
 0x1b3   : > { %s1483_s9 = scalar_lea.sflag [#allocation3], %s1482_s7 }
 0x1b4   : > { %p2031_p3 = pnand %p2034_p2, %p2349_p8 }
 0x1b6   : > { %2251 = dma.done.wait (!%p2031_p3), %s1483_s9, 4096  }
 0x1b7   : > { %2253 = vsyncadd (!%p2031_p3), %s1483_s9, 4294963200  ;;  %s16_s17 = sadd.s32 1, %s2276_s17   ;;  %s2676_s12 = smov %s2260_s13 }
 0x1b8   : > { %p13_p5 = scmp.ge.s32.totalorder %s16_s17, 6   ;;  %s2677_s13 = smov %s2264_s14 }
 0x1b9   : > { %s2678_s14 = smov %s2355_s25  ;;  %s2679_s15 = smov %s2272_s16 }
 0x1ba   : > { %s2680_s16 = smov %s2682_s20  ;;  %15 = sbr.rel (!%p13_p5) target bundleno = 4 (0x4), region = 73 }
 0x1c1   :  { %1488 = vsyncpa [#allocation3], 1 }
 0x1c2   :  { %1490 = vsyncpa [#allocation3 + $0x1], 1 }

</bundles_post_ra>
